<compile_context>
chip_gen: v7x
topology: tpu7x:2x2x1
jax: 0.10.0
libtpu: 0.0.40
codegen_flags: <defaults>
</compile_context>

<pallas_src>
import jax
import jax.numpy as jnp
from jax.experimental import pallas as pl
from jax.experimental.pallas import tpu as pltpu

# Padded (lane/sublane aligned) physical shapes.
BATCH_PAD = 8      # 1 full sublane
K_PAD = 896        # 7 * 128
HID_PAD = 128      # 1 lane-width
OUT_PAD = 128      # lane-dense output store

# Logical shapes of the original module.
IN_DIM = 784
HID_DIM = 100
OUT_DIM = 10


def mlp_kernel(x_ref, w1_ref, b1_ref, w2_ref, b2_ref, o_ref):
    # fc1: (Bp, 896) @ (896, 128) + (1, 128) -> relu   (all tiles (8,128)-aligned)
    h = jnp.dot(x_ref[...], w1_ref[...], preferred_element_type=jnp.float32)
    h = jnp.maximum(h + b1_ref[...], 0.0)
    # fc2: (Bp, 128) @ (128, 128) + (1, 128)
    out = jnp.dot(h, w2_ref[...], preferred_element_type=jnp.float32)
    o_ref[...] = (out + b2_ref[...]).astype(o_ref.dtype)


def _pad_to(a, shape):
    pads = [(0, t - s) for s, t in zip(a.shape, shape)]
    return jnp.pad(a, pads)


def pad_params(w1, b1, w2, b2):
    """Zero-pad parameters to lane/sublane aligned shapes (done once, hoisted)."""
    return (
        _pad_to(w1, (K_PAD, HID_PAD)),
        _pad_to(b1, (1, HID_PAD)),
        _pad_to(w2, (HID_PAD, OUT_PAD)),
        _pad_to(b2, (1, OUT_PAD)),
    )


@jax.jit
def net_forward(x, w1p, b1p, w2p, b2p):
    B = x.shape[0]
    bp = max(BATCH_PAD, ((B + 7) // 8) * 8)
    xp = _pad_to(x, (bp, K_PAD))

    out_padded = pl.pallas_call(
        mlp_kernel,
        out_shape=jax.ShapeDtypeStruct((bp, OUT_PAD), jnp.float32),
        in_specs=[
            pl.BlockSpec(xp.shape, lambda: (0, 0)),
            pl.BlockSpec(w1p.shape, lambda: (0, 0)),
            pl.BlockSpec(b1p.shape, lambda: (0, 0)),
            pl.BlockSpec(w2p.shape, lambda: (0, 0)),
            pl.BlockSpec(b2p.shape, lambda: (0, 0)),
        ],
        out_specs=pl.BlockSpec((bp, OUT_PAD), lambda: (0, 0)),
        compiler_params=pltpu.CompilerParams(vmem_limit_bytes=8 << 20),
    )(xp, w1p, b1p, w2p, b2p)

    # Slice back to the logical output; free in the XLA wrapper.
    return out_padded[:B, :OUT_DIM]


def init_params(key):
    # Deterministic init mimicking torch.nn.Linear (uniform in +/- 1/sqrt(fan_in)).
    # Weights stored as (in_features, out_features) so the kernel does x @ W + b.
    k1, k2, k3, k4 = jax.random.split(key, 4)
    bound1 = 1.0 / jnp.sqrt(float(IN_DIM))
    bound2 = 1.0 / jnp.sqrt(float(HID_DIM))
    w1 = jax.random.uniform(k1, (IN_DIM, HID_DIM), jnp.float32, -bound1, bound1)
    b1 = jax.random.uniform(k2, (1, HID_DIM), jnp.float32, -bound1, bound1)
    w2 = jax.random.uniform(k3, (HID_DIM, OUT_DIM), jnp.float32, -bound2, bound2)
    b2 = jax.random.uniform(k4, (1, OUT_DIM), jnp.float32, -bound2, bound2)
    return w1, b1, w2, b2


if __name__ == "__main__":
    key = jax.random.PRNGKey(0)
    kx, kp = jax.random.split(key)
    # torch.rand(4, 784) equivalent: uniform [0, 1)
    x = jax.random.uniform(kx, (4, IN_DIM), jnp.float32)
    w1, b1, w2, b2 = init_params(kp)

    # Pad once (would be hoisted out of any inference loop in real use).
    w1p, b1p, w2p, b2p = pad_params(w1, b1, w2, b2)

    out = net_forward(x, w1p, b1p, w2p, b2p)
    jax.block_until_ready(out)

    # Reference check in plain JAX against the unpadded parameters.
    ref = jnp.maximum(x @ w1 + b1, 0.0) @ w2 + b2
    assert out.shape == (4, OUT_DIM)
    assert jnp.allclose(out, ref, atol=1e-5, rtol=1e-5)
    print("KERNEL_OK")
</pallas_src>

<mosaic_0001>
module attributes {stable_mosaic.version = 11 : i64} {
  func.func @mlp_kernel(%arg0: memref<8x896xf32, #tpu.memory_space<vmem>>, %arg1: memref<896x128xf32, #tpu.memory_space<vmem>>, %arg2: memref<1x128xf32, #tpu.memory_space<vmem>>, %arg3: memref<128x128xf32, #tpu.memory_space<vmem>>, %arg4: memref<1x128xf32, #tpu.memory_space<vmem>>, %arg5: memref<8x128xf32, #tpu.memory_space<vmem>>) attributes {dimension_semantics = [], scalar_prefetch = 0 : i64, scratch_operands = 0 : i64, tpu.core_type = #tpu.core_type<tc>} {
    %c0 = arith.constant 0 : index
    %c0_0 = arith.constant 0 : index
    %0 = vector.load %arg0[%c0, %c0_0] : memref<8x896xf32, #tpu.memory_space<vmem>>, vector<8x896xf32>
    %c0_1 = arith.constant 0 : index
    %c0_2 = arith.constant 0 : index
    %1 = vector.load %arg1[%c0_1, %c0_2] : memref<896x128xf32, #tpu.memory_space<vmem>>, vector<896x128xf32>
    %cst = arith.constant dense<0.000000e+00> : vector<8x128xf32>
    %2 = tpu.matmul %0, %1, %cst {dimension_numbers = #tpu.dot_dimension_numbers<[1], [0], [0], [1], [0, 0, 1, 1], [], []>} : vector<8x896xf32>, vector<896x128xf32>, vector<8x128xf32> -> vector<8x128xf32>
    %c0_3 = arith.constant 0 : index
    %c0_4 = arith.constant 0 : index
    %3 = vector.load %arg2[%c0_3, %c0_4] : memref<1x128xf32, #tpu.memory_space<vmem>>, vector<1x128xf32>
    %4 = vector.broadcast %3 : vector<1x128xf32> to vector<8x128xf32>
    %5 = arith.addf %2, %4 : vector<8x128xf32>
    %cst_5 = arith.constant 0.000000e+00 : f32
    %6 = vector.broadcast %cst_5 : f32 to vector<8x128xf32>
    %7 = arith.maximumf %5, %6 : vector<8x128xf32>
    %c0_6 = arith.constant 0 : index
    %c0_7 = arith.constant 0 : index
    %8 = vector.load %arg3[%c0_6, %c0_7] : memref<128x128xf32, #tpu.memory_space<vmem>>, vector<128x128xf32>
    %cst_8 = arith.constant dense<0.000000e+00> : vector<8x128xf32>
    %9 = tpu.matmul %7, %8, %cst_8 {dimension_numbers = #tpu.dot_dimension_numbers<[1], [0], [0], [1], [0, 0, 1, 1], [], []>} : vector<8x128xf32>, vector<128x128xf32>, vector<8x128xf32> -> vector<8x128xf32>
    %c0_9 = arith.constant 0 : index
    %c0_10 = arith.constant 0 : index
    %10 = vector.load %arg4[%c0_9, %c0_10] : memref<1x128xf32, #tpu.memory_space<vmem>>, vector<1x128xf32>
    %11 = vector.broadcast %10 : vector<1x128xf32> to vector<8x128xf32>
    %12 = arith.addf %9, %11 : vector<8x128xf32>
    %c0_11 = arith.constant 0 : index
    %c0_12 = arith.constant 0 : index
    %13 = vector.load %arg5[%c0_11, %c0_12] : memref<8x128xf32, #tpu.memory_space<vmem>>, vector<8x128xf32>
    tpu.vector_store %arg5[%c0_11, %c0_12], %12 {strides = array<i32>} : memref<8x128xf32, #tpu.memory_space<vmem>>, vector<8x128xf32>,
    return
  }
}

</mosaic_0001>

<bundles_post_ra>
// kernel: net_forward.1
= control target key start
LH: loop header
LB: loop body
LE: loop exit
PB: predicated region body
PF: predicated region fallthrough
CT: control target
= control target key end

     0   :  { %10 = vsyncpa [#allocation3], 0  ;;  %s1076_s0 = inlined_call_operand.vmem [shape: f32[8,896], index: 0, kind: input, shape index: {}]   ;;  %s1077_s1 = inlined_call_operand.hbm [shape: f32[896,128], index: 1, kind: input, shape index: {}]   ;;  %s1078_s2 = inlined_call_operand.vmem [shape: f32[1,128], index: 2, kind: input, shape index: {}]   ;;  %s1079_s3 = inlined_call_operand.hbm [shape: f32[128,128], index: 3, kind: input, shape index: {}]   ;;  %s1080_s4 = inlined_call_operand.vmem [shape: f32[1,128], index: 4, kind: input, shape index: {}]   ;;  %s1081_s5 = inlined_call_operand.vmem [shape: f32[8,128], index: 5, kind: output, shape index: {}]  }
   0x1   :  { %11 = vsyncpa [#allocation5], 0  ;;  %s965_s18 = smov [#allocation2]   ;;  %s917_s22 = scalar_lea.hbm %s1077_s1, 14336 }
   0x2   :  { %s19_s19 = sshll.u32 %s965_s18, 4  ;;  %p918_p0 = scmp.ne.s32.totalorder %s1077_s1, %s917_s22  ;;  %s20_s19 = int_to_ptr.vmem [resolvable:$true] %s19_s19 }
   0x3   :  { %p921_p1 = scmp.lt.u32.totalorder %s917_s22, %s1077_s1 }
   0x5   :  { %p923_p2 = pnand %p921_p1, %p918_p0 }
   0x7   :  { %926 = shalt.err (!%p923_p2)
}
   0x8   :  { %s927_s27 = scalar_lea.vmem %s20_s19, 14336  ;;  %p932_p4 = scmp.lt.s32.totalorder %s20_s19, %s20_s19 }
   0x9   :  { %p928_p3 = scmp.ne.s32.totalorder %s20_s19, %s927_s27  ;;  %p933_p5 = scmp.lt.s32.totalorder %s927_s27, %s927_s27 }
   0xb   :  { %p934_p6 = por %p933_p5, %p932_p4 }
   0xd   :  { %p935_p7 = pnand %p934_p6, %p928_p3 }
   0xf   :  { %938 = shalt.err (!%p935_p7)
}
  0x10   :  { %s966_s28 = smov 128   ;;  %s967_s29 = smov 8  }
  0x11   :  { %25 = dma.hbm_to_vmem [thread:$0]  %s1077_s1, 14336, %s20_s19, [#allocation3], %s966_s28, %s966_s28, %s967_s29  }
  0x12   :  { %s968_s7 = smov [#allocation4]   ;;  %s939_s11 = scalar_lea.hbm %s1079_s3, 2048 }
  0x13   :  { %s33_s8 = sshll.u32 %s968_s7, 4  ;;  %p940_p8 = scmp.ne.s32.totalorder %s1079_s3, %s939_s11  ;;  %s34_s8 = int_to_ptr.vmem [resolvable:$true] %s33_s8 }
  0x14   :  { %p943_p9 = scmp.lt.u32.totalorder %s939_s11, %s1079_s3 }
  0x16   :  { %p945_p10 = pnand %p943_p9, %p940_p8 }
  0x18   :  { %948 = shalt.err (!%p945_p10)
}
  0x19   :  { %s949_s16 = scalar_lea.vmem %s34_s8, 2048  ;;  %p954_p12 = scmp.lt.s32.totalorder %s34_s8, %s34_s8 }
  0x1a   :  { %p950_p11 = scmp.ne.s32.totalorder %s34_s8, %s949_s16  ;;  %p955_p13 = scmp.lt.s32.totalorder %s949_s16, %s949_s16 }
  0x1c   :  { %p956_p0 = por %p955_p13, %p954_p12 }
  0x1e   :  { %p957_p1 = pnand %p956_p0, %p950_p11 }
  0x20   :  { %960 = shalt.err (!%p957_p1)
}
  0x21   :  { %39 = dma.hbm_to_vmem [thread:$0]  %s1079_s3, 2048, %s34_s8, [#allocation5], %s966_s28, %s966_s28, %s967_s29  }
  0x22   :  { %961 = dma.done.wait [#allocation3], 14336  }
  0x23   :  { %962 = vsyncadd [#allocation3], 4294952960 }
  0x24   :  { %963 = dma.done.wait [#allocation5], 2048  }
  0x25   :  { %964 = vsyncadd [#allocation5], 4294965248  ;;  %v71_v0 = vld [vmem:[#allocation2 + $0x80] sm:$0xff]  ;;  %v72_v1 = vld [vmem:[#allocation2 + $0x88] sm:$0xff]  ;;  %vm970_vm0 = vmmov 0  }
  0x26   :  { %v55_v2 = vld [vmem:[#allocation2] sm:$0xff]  ;;  %v766_v3 = vpack.c.bf16 %v72_v1, %v71_v0  ;;  %v56_v4 = vld [vmem:[#allocation2 + $0x8] sm:$0xff]  ;;  %v73_v11 = vld [vmem:[#allocation2 + $0x90] sm:$0xff] }
  0x27   :  { %v103_v5 = vld [vmem:[#allocation2 + $0x180] sm:$0xff]  ;;  %v104_v6 = vld [vmem:[#allocation2 + $0x188] sm:$0xff]  ;;  %v768_v7 = vpack.c.bf16 %v56_v4, %v55_v2  ;;  %v74_v13 = vld [vmem:[#allocation2 + $0x98] sm:$0xff] }
  0x28   :  { %v798_v8 = vpack.c.bf16 %v104_v6, %v103_v5  ;;  %v87_v9 = vld [vmem:[#allocation2 + $0x100] sm:$0xff]  ;;  %v88_v10 = vld [vmem:[#allocation2 + $0x108] sm:$0xff]  ;;  %767 = vmatprep.subr.bf16.mxu0 %v766_v3  ;;  %v57_v14 = vld [vmem:[#allocation2 + $0x10] sm:$0xff]  ;;  %v770_v16 = vpack.c.bf16 %v74_v13, %v73_v11 }
  0x29   :  { %v800_v12 = vpack.c.bf16 %v88_v10, %v87_v9  ;;  %v58_v15 = vld [vmem:[#allocation2 + $0x18] sm:$0xff]  ;;  %769 = vmatpush3.bf16.msra.mxu0 %v768_v7  ;;  %v105_v18 = vld [vmem:[#allocation2 + $0x190] sm:$0xff]  ;;  %v75_v23 = vld [vmem:[#allocation2 + $0xa0] sm:$0xff] }
  0x2a   :  { %799 = vmatprep.subr.bf16.mxu1 %v798_v8  ;;  %v772_v17 = vpack.c.bf16 %v58_v15, %v57_v14  ;;  %v106_v19 = vld [vmem:[#allocation2 + $0x198] sm:$0xff]  ;;  %v89_v20 = vld [vmem:[#allocation2 + $0x110] sm:$0xff]  ;;  %v76_v24 = vld [vmem:[#allocation2 + $0xa8] sm:$0xff]  ;;  %771 = vmatprep.subr.bf16.mxu0 %v770_v16 }
  0x2b   :  { %801 = vmatpush3.bf16.msra.mxu1 %v800_v12  ;;  %v802_v21 = vpack.c.bf16 %v106_v19, %v105_v18  ;;  %v90_v22 = vld [vmem:[#allocation2 + $0x118] sm:$0xff]  ;;  %v774_v26 = vpack.c.bf16 %v76_v24, %v75_v23  ;;  %v59_v27 = vld [vmem:[#allocation2 + $0x20] sm:$0xff]  ;;  %v60_v28 = vld [vmem:[#allocation2 + $0x28] sm:$0xff] }
  0x2c   :  { %v804_v25 = vpack.c.bf16 %v90_v22, %v89_v20  ;;  %v107_v29 = vld [vmem:[#allocation2 + $0x1a0] sm:$0xff]  ;;  %v108_v30 = vld [vmem:[#allocation2 + $0x1a8] sm:$0xff]  ;;  %v776_v33 = vpack.c.bf16 %v60_v28, %v59_v27  ;;  %v77_v35 = vld [vmem:[#allocation2 + $0xb0] sm:$0xff] }
  0x2d   :  { %803 = vmatprep.subr.bf16.mxu1 %v802_v21  ;;  %v91_v31 = vld [vmem:[#allocation2 + $0x120] sm:$0xff]  ;;  %v92_v32 = vld [vmem:[#allocation2 + $0x128] sm:$0xff]  ;;  %773 = vmatpush3.bf16.msra.mxu0 %v772_v17  ;;  %v806_v34 = vpack.c.bf16 %v108_v30, %v107_v29  ;;  %v78_v36 = vld [vmem:[#allocation2 + $0xb8] sm:$0xff] }
  0x2e   :  { %v61_v37 = vld [vmem:[#allocation2 + $0x30] sm:$0xff]  ;;  %775 = vmatprep.subr.bf16.mxu0 %v774_v26  ;;  %v808_v38 = vpack.c.bf16 %v92_v32, %v91_v31  ;;  %v778_v39 = vpack.c.bf16 %v78_v36, %v77_v35  ;;  %v62_v40 = vld [vmem:[#allocation2 + $0x38] sm:$0xff]  ;;  %v79_v46 = vld [vmem:[#allocation2 + $0xc0] sm:$0xff] }
  0x2f   :  { %805 = vmatpush3.bf16.msra.mxu1 %v804_v25  ;;  %v109_v41 = vld [vmem:[#allocation2 + $0x1b0] sm:$0xff]  ;;  %v110_v42 = vld [vmem:[#allocation2 + $0x1b8] sm:$0xff]  ;;  %v80_v47 = vld [vmem:[#allocation2 + $0xc8] sm:$0xff]  ;;  %v780_v48 = vpack.c.bf16 %v62_v40, %v61_v37 }
  0x30   :  { %807 = vmatprep.subr.bf16.mxu1 %v806_v34  ;;  %v810_v43 = vpack.c.bf16 %v110_v42, %v109_v41  ;;  %v93_v44 = vld [vmem:[#allocation2 + $0x130] sm:$0xff]  ;;  %v94_v45 = vld [vmem:[#allocation2 + $0x138] sm:$0xff]  ;;  %v111_v49 = vld [vmem:[#allocation2 + $0x1c0] sm:$0xff]  ;;  %v782_v52 = vpack.c.bf16 %v80_v47, %v79_v46 }
  0x31   :  { %777 = vmatpush3.bf16.msra.mxu0 %v776_v33  ;;  %v112_v50 = vld [vmem:[#allocation2 + $0x1c8] sm:$0xff]  ;;  %v812_v51 = vpack.c.bf16 %v94_v45, %v93_v44  ;;  %v63_v53 = vld [vmem:[#allocation2 + $0x40] sm:$0xff]  ;;  %v81_v58 = vld [vmem:[#allocation2 + $0xd0] sm:$0xff] }
  0x32   :  { %779 = vmatprep.subr.bf16.mxu0 %v778_v39  ;;  %v64_v54 = vld [vmem:[#allocation2 + $0x48] sm:$0xff]  ;;  %v95_v55 = vld [vmem:[#allocation2 + $0x140] sm:$0xff]  ;;  %v814_v56 = vpack.c.bf16 %v112_v50, %v111_v49  ;;  %v82_v59 = vld [vmem:[#allocation2 + $0xd8] sm:$0xff] }
  0x33   :  { %809 = vmatpush3.bf16.msra.mxu1 %v808_v38  ;;  %v96_v57 = vld [vmem:[#allocation2 + $0x148] sm:$0xff]  ;;  %v113_v60 = vld [vmem:[#allocation2 + $0x1d0] sm:$0xff]  ;;  %v114_v61 = vld [vmem:[#allocation2 + $0x1d8] sm:$0xff]  ;;  %v784_v62 = vpack.c.bf16 %v64_v54, %v63_v53  ;;  %v786_v0 = vpack.c.bf16 %v82_v59, %v81_v58 }
  0x34   :  { %811 = vmatprep.subr.bf16.mxu1 %v810_v43  ;;  %v816_v63 = vpack.c.bf16 %v96_v57, %v95_v55  ;;  %v65_v1 = vld [vmem:[#allocation2 + $0x50] sm:$0xff]  ;;  %v66_v2 = vld [vmem:[#allocation2 + $0x58] sm:$0xff]  ;;  %v818_v4 = vpack.c.bf16 %v114_v61, %v113_v60  ;;  %v83_v6 = vld [vmem:[#allocation2 + $0xe0] sm:$0xff] }
  0x35   :  { %781 = vmatpush3.bf16.msra.mxu0 %v780_v48  ;;  %v97_v3 = vld [vmem:[#allocation2 + $0x150] sm:$0xff]  ;;  %v98_v5 = vld [vmem:[#allocation2 + $0x158] sm:$0xff]  ;;  %v84_v7 = vld [vmem:[#allocation2 + $0xe8] sm:$0xff]  ;;  %v788_v10 = vpack.c.bf16 %v66_v2, %v65_v1  ;;  %v971_v1 = vmov 0.0  }
  0x36   :  { %783 = vmatprep.subr.bf16.mxu0 %v782_v52  ;;  %v115_v8 = vld [vmem:[#allocation2 + $0x1e0] sm:$0xff]  ;;  %v116_v9 = vld [vmem:[#allocation2 + $0x1e8] sm:$0xff]  ;;  %v820_v13 = vpack.c.bf16 %v98_v5, %v97_v3  ;;  %v790_v14 = vpack.c.bf16 %v84_v7, %v83_v6  ;;  %v85_v19 = vld [vmem:[#allocation2 + $0xf0] sm:$0xff] }
  0x37   :  { %813 = vmatpush3.bf16.msra.mxu1 %v812_v51  ;;  %v67_v11 = vld [vmem:[#allocation2 + $0x60] sm:$0xff]  ;;  %v49_v12 = vld [vmem:[%s1076_s0 + $0x8] sm:$0xff]  ;;  %v822_v18 = vpack.c.bf16 %v116_v9, %v115_v8  ;;  %v86_v20 = vld [vmem:[#allocation2 + $0xf8] sm:$0xff]  ;;  %v969_v51 = vmov 0.0|0.0  }
  0x38   :  { %815 = vmatprep.subr.bf16.mxu1 %v814_v56  ;;  %v68_v15 = vld [vmem:[#allocation2 + $0x68] sm:$0xff]  ;;  %v99_v16 = vld [vmem:[#allocation2 + $0x160] sm:$0xff]  ;;  %238 = vmatprep.mubr.f32.mxu0 %v49_v12  ;;  %v51_v21 = vld [vmem:[%s1076_s0 + $0x18] sm:$0xff]  ;;  %v794_v26 = vpack.c.bf16 %v86_v20, %v85_v19 }
  0x39   :  { %785 = vmatpush3.bf16.msra.mxu0 %v784_v62  ;;  %v100_v17 = vld [vmem:[#allocation2 + $0x168] sm:$0xff]  ;;  %v117_v22 = vld [vmem:[#allocation2 + $0x1f0] sm:$0xff]  ;;  %v118_v23 = vld [vmem:[#allocation2 + $0x1f8] sm:$0xff]  ;;  %308 = vmatprep.mubr.f32.mxu1 %v51_v21  ;;  %v792_v24 = vpack.c.bf16 %v68_v15, %v67_v11 }
  0x3a   :  { %787 = vmatprep.subr.bf16.mxu0 %v786_v0  ;;  %v824_v25 = vpack.c.bf16 %v100_v17, %v99_v16  ;;  %v69_v27 = vld [vmem:[#allocation2 + $0x70] sm:$0xff]  ;;  %v70_v28 = vld [vmem:[#allocation2 + $0x78] sm:$0xff]  ;;  %v826_v30 = vpack.c.bf16 %v118_v23, %v117_v22  ;;  %v135_v32 = vld [vmem:[#allocation2 + $0x280] sm:$0xff] }
  0x3b   :  { %817 = vmatpush3.bf16.msra.mxu1 %v816_v63  ;;  %v101_v29 = vld [vmem:[#allocation2 + $0x170] sm:$0xff]  ;;  %v102_v31 = vld [vmem:[#allocation2 + $0x178] sm:$0xff]  ;;  %v136_v33 = vld [vmem:[#allocation2 + $0x288] sm:$0xff]  ;;  %v796_v34 = vpack.c.bf16 %v70_v28, %v69_v27 }
  0x3c   :  { %819 = vmatprep.subr.bf16.mxu1 %v818_v4  ;;  %v828_v35 = vpack.c.bf16 %v102_v31, %v101_v29  ;;  %v830_v36 = vpack.c.bf16 %v136_v33, %v135_v32  ;;  %v119_v37 = vld [vmem:[#allocation2 + $0x200] sm:$0xff]  ;;  %v120_v38 = vld [vmem:[#allocation2 + $0x208] sm:$0xff]  ;;  %v137_v39 = vld [vmem:[#allocation2 + $0x290] sm:$0xff] }
  0x3d   :  { %789 = vmatpush3.bf16.msra.mxu0 %v788_v10  ;;  %v138_v40 = vld [vmem:[#allocation2 + $0x298] sm:$0xff]  ;;  %v151_v41 = vld [vmem:[#allocation2 + $0x300] sm:$0xff]  ;;  %v152_v42 = vld [vmem:[#allocation2 + $0x308] sm:$0xff]  ;;  %v832_v44 = vpack.c.bf16 %v120_v38, %v119_v37 }
  0x3e   :  { %791 = vmatprep.subr.bf16.mxu0 %v790_v14  ;;  %v48_v43 = vld [vmem:[%s1076_s0] sm:$0xff]  ;;  %v50_v45 = vld [vmem:[%s1076_s0 + $0x10] sm:$0xff]  ;;  %v834_v46 = vpack.c.bf16 %v138_v40, %v137_v39  ;;  %v122_v48 = vld [vmem:[#allocation2 + $0x218] sm:$0xff]  ;;  %v863_v49 = vpack.c.bf16 %v152_v42, %v151_v41 }
  0x3f   :  { %821 = vmatpush3.bf16.msra.mxu1 %v820_v13  ;;  %v121_v47 = vld [vmem:[#allocation2 + $0x210] sm:$0xff]  ;;  %v139_v50 = vld [vmem:[#allocation2 + $0x2a0] sm:$0xff]  ;;  %v140_v52 = vld [vmem:[#allocation2 + $0x2a8] sm:$0xff] }
  0x40   :  { %823 = vmatprep.subr.bf16.mxu1 %v822_v18  ;;  %v153_v53 = vld [vmem:[#allocation2 + $0x310] sm:$0xff]  ;;  %v154_v54 = vld [vmem:[#allocation2 + $0x318] sm:$0xff]  ;;  %v836_v55 = vpack.c.bf16 %v122_v48, %v121_v47  ;;  %v123_v56 = vld [vmem:[#allocation2 + $0x220] sm:$0xff]  ;;  %v838_v57 = vpack.c.bf16 %v140_v52, %v139_v50 }
  0x41   :  { %793 = vmatpush3.bf16.msra.mxu0 %v792_v24  ;;  %v124_v58 = vld [vmem:[#allocation2 + $0x228] sm:$0xff]  ;;  %v866_v59 = vpack.c.bf16 %v154_v54, %v153_v53  ;;  %v141_v60 = vld [vmem:[#allocation2 + $0x2b0] sm:$0xff]  ;;  %v142_v61 = vld [vmem:[#allocation2 + $0x2b8] sm:$0xff] }
  0x42   :  { %795 = vmatprep.subr.bf16.mxu0 %v794_v26  ;;  %v155_v62 = vld [vmem:[#allocation2 + $0x320] sm:$0xff]  ;;  %v156_v63 = vld [vmem:[#allocation2 + $0x328] sm:$0xff]  ;;  %v840_v2 = vpack.c.bf16 %v124_v58, %v123_v56  ;;  %v842_v3 = vpack.c.bf16 %v142_v61, %v141_v60  ;;  %v125_v4 = vld [vmem:[#allocation2 + $0x230] sm:$0xff] }
  0x43   :  { %825 = vmatpush3.bf16.msra.mxu1 %v824_v25  ;;  %v53_v0 = vld [vmem:[%s1076_s0 + $0x28] sm:$0xff]  ;;  %v126_v5 = vld [vmem:[#allocation2 + $0x238] sm:$0xff]  ;;  %v869_v6 = vpack.c.bf16 %v156_v63, %v155_v62  ;;  %v143_v7 = vld [vmem:[#allocation2 + $0x2c0] sm:$0xff] }
  0x44   :  { %827 = vmatprep.subr.bf16.mxu1 %v826_v30  ;;  %v144_v8 = vld [vmem:[#allocation2 + $0x2c8] sm:$0xff]  ;;  %v157_v9 = vld [vmem:[#allocation2 + $0x330] sm:$0xff]  ;;  %v158_v10 = vld [vmem:[#allocation2 + $0x338] sm:$0xff]  ;;  %v844_v11 = vpack.c.bf16 %v126_v5, %v125_v4 }
  0x45   :  { %797 = vmatpush3.bf16.msra.mxu0 %v796_v34  ;;  %v846_v12 = vpack.c.bf16 %v144_v8, %v143_v7  ;;  %v127_v13 = vld [vmem:[#allocation2 + $0x240] sm:$0xff]  ;;  %v128_v14 = vld [vmem:[#allocation2 + $0x248] sm:$0xff]  ;;  %v872_v15 = vpack.c.bf16 %v158_v10, %v157_v9  ;;  %v145_v16 = vld [vmem:[#allocation2 + $0x2d0] sm:$0xff] }
  0x46   :  { %831 = vmatprep.subr.bf16.mxu0 %v830_v36  ;;  %v146_v17 = vld [vmem:[#allocation2 + $0x2d8] sm:$0xff]  ;;  %v159_v18 = vld [vmem:[#allocation2 + $0x340] sm:$0xff]  ;;  %v160_v19 = vld [vmem:[#allocation2 + $0x348] sm:$0xff]  ;;  %v848_v20 = vpack.c.bf16 %v128_v14, %v127_v13 }
  0x47   :  { %829 = vmatpush3.bf16.msra.mxu1 %v828_v35  ;;  %v850_v21 = vpack.c.bf16 %v146_v17, %v145_v16  ;;  %v129_v22 = vld [vmem:[#allocation2 + $0x250] sm:$0xff]  ;;  %v130_v23 = vld [vmem:[#allocation2 + $0x258] sm:$0xff]  ;;  %v875_v24 = vpack.c.bf16 %v160_v19, %v159_v18  ;;  %v147_v25 = vld [vmem:[#allocation2 + $0x2e0] sm:$0xff] }
  0x48   :  { %862 = vmatprep.subr.bf16.mxu1 %v969_v51  ;;  %239 = vmatmul.mubr.f32.vlgmr.msra.gmra.mrb[0].mxu0 %v48_v43  ;;  %v148_v26 = vld [vmem:[#allocation2 + $0x2e8] sm:$0xff]  ;;  %v161_v27 = vld [vmem:[#allocation2 + $0x350] sm:$0xff]  ;;  %v162_v28 = vld [vmem:[#allocation2 + $0x358] sm:$0xff]  ;;  %v852_v29 = vpack.c.bf16 %v130_v23, %v129_v22 }
  0x49   :  { %833 = vmatpush3.bf16.msra.mxu0 %v832_v44  ;;  %378 = vmatprep.mubr.f32.mxu0 %v53_v0  ;;  %v854_v30 = vpack.c.bf16 %v148_v26, %v147_v25  ;;  %v131_v31 = vld [vmem:[#allocation2 + $0x260] sm:$0xff]  ;;  %v132_v32 = vld [vmem:[#allocation2 + $0x268] sm:$0xff]  ;;  %v878_v33 = vpack.c.bf16 %v162_v28, %v161_v27  ;;  %v149_v34 = vld [vmem:[#allocation2 + $0x2f0] sm:$0xff] }
  0x4a   :  { %309 = vmatmul.mubr.f32.vlgmr.msra.gmra.mrb[0].mxu1 %v50_v45  ;;  %835 = vmatprep.subr.bf16.mxu0 %v834_v46  ;;  %v150_v35 = vld [vmem:[#allocation2 + $0x2f8] sm:$0xff]  ;;  %v163_v36 = vld [vmem:[#allocation2 + $0x360] sm:$0xff]  ;;  %v164_v37 = vld [vmem:[#allocation2 + $0x368] sm:$0xff]  ;;  %v856_v38 = vpack.c.bf16 %v132_v32, %v131_v31 }
  0x4b   :  { %864 = vmatpush3.bf16.msra.mxu1 %v863_v49  ;;  %728 = vmatprep.mubr.msk.f32.mxu1 %vm970_vm0, %v971_v1  ;;  %v858_v39 = vpack.c.bf16 %v150_v35, %v149_v34  ;;  %v133_v40 = vld [vmem:[#allocation2 + $0x270] sm:$0xff]  ;;  %v134_v41 = vld [vmem:[#allocation2 + $0x278] sm:$0xff]  ;;  %v881_v42 = vpack.c.bf16 %v164_v37, %v163_v36  ;;  %v52_v47 = vld [vmem:[%s1076_s0 + $0x20] sm:$0xff] }
  0x4c   :  { %865 = vmatprep.subr.bf16.mxu1 %v969_v51  ;;  %v165_v43 = vld [vmem:[#allocation2 + $0x370] sm:$0xff]  ;;  %v166_v44 = vld [vmem:[#allocation2 + $0x378] sm:$0xff]  ;;  %v860_v45 = vpack.c.bf16 %v134_v41, %v133_v40  ;;  %v455_v49 = vld [vmem:[#allocation4] sm:$0xff] }
  0x4d   :  { %837 = vmatpush3.bf16.msra.mxu0 %v836_v55  ;;  %v884_v46 = vpack.c.bf16 %v166_v44, %v165_v43  ;;  %v54_v48 = vld [vmem:[%s1076_s0 + $0x30] sm:$0xff]  ;;  %v456_v50 = vld [vmem:[#allocation4 + $0x8] sm:$0xff]  ;;  %v458_v54 = vld [vmem:[#allocation4 + $0x18] sm:$0xff] }
  0x4e   :  { %839 = vmatprep.subr.bf16.mxu0 %v838_v57  ;;  %v457_v52 = vld [vmem:[#allocation4 + $0x10] sm:$0xff]  ;;  %v887_v53 = vpack.c.bf16 %v456_v50, %v455_v49  ;;  %v459_v56 = vld [vmem:[#allocation4 + $0x20] sm:$0xff]  ;;  %v460_v57 = vld [vmem:[#allocation4 + $0x28] sm:$0xff] }
  0x4f   :  { %867 = vmatpush3.bf16.msra.mxu1 %v866_v59  ;;  %v890_v55 = vpack.c.bf16 %v458_v54, %v457_v52  ;;  %v893_v58 = vpack.c.bf16 %v460_v57, %v459_v56  ;;  %v461_v59 = vld [vmem:[#allocation4 + $0x30] sm:$0xff]  ;;  %v462_v60 = vld [vmem:[#allocation4 + $0x38] sm:$0xff]  ;;  %v463_v62 = vld [vmem:[#allocation4 + $0x40] sm:$0xff] }
  0x50   :  { %868 = vmatprep.subr.bf16.mxu1 %v969_v51  ;;  %v896_v61 = vpack.c.bf16 %v462_v60, %v461_v59  ;;  %v464_v63 = vld [vmem:[#allocation4 + $0x48] sm:$0xff]  ;;  %v467_v4 = vld [vmem:[#allocation4 + $0x60] sm:$0xff]  ;;  %v469_v7 = vld [vmem:[#allocation4 + $0x70] sm:$0xff] }
  0x51   :  { %841 = vmatpush3.bf16.msra.mxu0 %v840_v2  ;;  %v899_v0 = vpack.c.bf16 %v464_v63, %v463_v62  ;;  %v466_v2 = vld [vmem:[#allocation4 + $0x58] sm:$0xff]  ;;  %v468_v5 = vld [vmem:[#allocation4 + $0x68] sm:$0xff]  ;;  %v556_v26 = vld [vmem:[%s1080_s4] ss:$0 sm:$0xff] }
  0x52   :  { %843 = vmatprep.subr.bf16.mxu0 %v842_v3  ;;  %v470_v8 = vld [vmem:[#allocation4 + $0x78] sm:$0xff] }
  0x53   :  { %870 = vmatpush3.bf16.msra.mxu1 %v869_v6  ;;  %v905_v6 = vpack.c.bf16 %v468_v5, %v467_v4  ;;  %v908_v9 = vpack.c.bf16 %v470_v8, %v469_v7 }
  0x54   :  { %871 = vmatprep.subr.bf16.mxu1 %v969_v51 }
  0x55   :  { %845 = vmatpush3.bf16.msra.mxu0 %v844_v11  ;;  %v555_v11 = vld [vmem:[%s1078_s2] ss:$0 sm:$0xff] }
  0x56   :  { %847 = vmatprep.subr.bf16.mxu0 %v846_v12 }
  0x57   :  { %873 = vmatpush3.bf16.msra.mxu1 %v872_v15 }
  0x58   :  { %874 = vmatprep.subr.bf16.mxu1 %v969_v51 }
  0x59   :  { %849 = vmatpush3.bf16.msra.mxu0 %v848_v20 }
  0x5a   :  { %851 = vmatprep.subr.bf16.mxu0 %v850_v21 }
  0x5b   :  { %876 = vmatpush3.bf16.msra.mxu1 %v875_v24 }
  0x5c   :  { %877 = vmatprep.subr.bf16.mxu1 %v969_v51 }
  0x5d   :  { %853 = vmatpush3.bf16.msra.mxu0 %v852_v29 }
  0x5e   :  { %855 = vmatprep.subr.bf16.mxu0 %v854_v30 }
  0x5f   :  { %879 = vmatpush3.bf16.msra.mxu1 %v878_v33 }
  0x60   :  { %880 = vmatprep.subr.bf16.mxu1 %v969_v51 }
  0x61   :  { %857 = vmatpush3.bf16.msra.mxu0 %v856_v38 }
  0x62   :  { %859 = vmatprep.subr.bf16.mxu0 %v858_v39 }
  0x63   :  { %882 = vmatpush3.bf16.msra.mxu1 %v881_v42 }
  0x64   :  { %883 = vmatprep.subr.bf16.mxu1 %v969_v51 }
  0x65   :  { %861 = vmatpush3.bf16.msra.mxu0 %v860_v45 }
  0x66   :  { %886 = vmatprep.subr.bf16.mxu0 %v969_v51 }
  0x67   :  { %885 = vmatpush3.bf16.msra.mxu1 %v884_v46 }
  0x68   :  { %379 = vmatmul.mubr.f32.vlgmr.msra.gmra.mrb[2].mxu0 %v52_v47 }
  0x69   :  { %763 = vmatprep.mubr.msk.f32.mxu0 %vm970_vm0, %v971_v1  ;;  %888 = vmatpush3.bf16.msra.mxu0 %v887_v53  ;;  %v465_v1 = vld [vmem:[#allocation4 + $0x50] sm:$0xff] }
  0x6a   :  { %729 = vmatmul.mubr.f32.vlgmr.msra.gmra.mrb[2].mxu1 %v54_v48  ;;  %889 = vmatprep.subr.bf16.mxu0 %v969_v51  ;;  %v902_v3 = vpack.c.bf16 %v466_v2, %v465_v1 }
  0x6d   :  { %891 = vmatpush3.bf16.msra.mxu0 %v890_v55 }
  0x6e   :  { %892 = vmatprep.subr.bf16.mxu0 %v969_v51 }
  0x71   :  { %894 = vmatpush3.bf16.msra.mxu0 %v893_v58 }
  0x72   :  { %895 = vmatprep.subr.bf16.mxu0 %v969_v51 }
  0x75   :  { %897 = vmatpush3.bf16.msra.mxu0 %v896_v61 }
  0x76   :  { %898 = vmatprep.subr.bf16.mxu0 %v969_v51 }
  0x79   :  { %900 = vmatpush3.bf16.msra.mxu0 %v899_v0 }
  0x7a   :  { %901 = vmatprep.subr.bf16.mxu0 %v969_v51 }
  0x7d   :  { %903 = vmatpush3.bf16.msra.mxu0 %v902_v3 }
  0x7e   :  { %904 = vmatprep.subr.bf16.mxu0 %v969_v51 }
  0x81   :  { %906 = vmatpush3.bf16.msra.mxu0 %v905_v6 }
  0x82   :  { %907 = vmatprep.subr.bf16.mxu0 %v969_v51 }
  0x85   :  { %909 = vmatpush3.bf16.msra.mxu0 %v908_v9 }
 0x11b   :  { %v589_v10 = vpop.f32.mrb[0].mxu0 }
 0x11c   :  { %v590_v12 = vpop.f32.mrb[1].mxu0 }
 0x11d   :  { %v624_v13 = vpop.f32.mrb[0].mxu1  ;;  %v591_v14 = vadd.f32 %v590_v12, %v589_v10 }
 0x11e   :  { %v625_v15 = vpop.f32.mrb[1].mxu1 }
 0x11f   :  { %v626_v16 = vadd.f32 %v625_v15, %v624_v13  ;;  %v241_v17 = vadd.f32 %v591_v14, %v555_v11 }
 0x121   :  { %v311_v18 = vadd.f32 %v626_v16, %v241_v17 }
 0x13b   :  { %v659_v19 = vpop.f32.mrb[2].mxu0 }
 0x13c   :  { %v660_v20 = vpop.f32.mrb[3].mxu0 }
 0x13d   :  { %v450_v21 = vpop.f32.mrb[2].mxu1  ;;  %v661_v51 = vadd.f32 %v660_v20, %v659_v19 }
 0x13e   :  { %v730_v22 = vpop.f32.mrb[3].mxu1 }
 0x13f   :  { %v381_v23 = vadd.f32 %v661_v51, %v311_v18 }
 0x141   :  { %v451_v24 = vadd.f32 %v450_v21, %v381_v23 }
 0x143   :  { %v454_v25 = vmax.f32 %v451_v24, 0.0 }
 0x145   :  { %764 = vmatmul.mubr.f32.vlgmr.msra.gmra.mrb[4].mxu0 %v454_v25 }
 0x218   :  { %v544_v27 = vpop.f32.mrb[4].mxu0 }
 0x219   :  { %v545_v28 = vadd.f32 %v556_v26, %v544_v27  ;;  %v765_v29 = vpop.f32.mrb[5].mxu0 }
 0x21b   :  { %548 = vst [vmem:[%s1081_s5] sm:$0xff] %v545_v28 }
 0x21c   :  { %553 = vsyncpa [#allocation3], 1 }
 0x21d   :  { %554 = vsyncpa [#allocation5], 1 }

</bundles_post_ra>
